<compile_context>
chip_gen: v7x
topology: tpu7x:2x2x1
jax: 0.10.0
libtpu: 0.0.40
codegen_flags: <defaults>
</compile_context>

<pallas_src>
import functools

import jax
import jax.numpy as jnp
from jax.experimental import pallas as pl
from jax.experimental.pallas import tpu as pltpu


def _round_up(x, m):
    return ((x + m - 1) // m) * m


def _block_spec(shape, index_map, *, buffer_count=None):
    """BlockSpec helper; falls back to default buffering if pipeline_mode is
    unsupported by the installed JAX version."""
    if buffer_count is None:
        return pl.BlockSpec(shape, index_map)
    try:
        return pl.BlockSpec(shape, index_map, pipeline_mode=pl.Buffered(buffer_count))
    except TypeError:  # older pallas without pipeline_mode kwarg
        return pl.BlockSpec(shape, index_map)


def _gabor_kernel(x_ref, w_ref, b_ref, o_ref, *, tn):
    # (bm, in) @ (in, 2*tn): single MXU matmul, f32 accumulation.
    lin = jnp.dot(x_ref[...], w_ref[...], preferred_element_type=jnp.float32)
    lin = lin + b_ref[...]
    # omega0 / sqrt(sigma0) are folded into W and b in the wrapper.  tn is a
    # multiple of 128, so both halves are lane-tile aligned slices.
    omega = lin[:, :tn]
    scale = lin[:, tn:]
    o_ref[...] = (jnp.cos(omega) * jnp.exp(-(scale * scale))).astype(o_ref.dtype)


def real_gabor_layer(x, weight, bias, *, omega0=10.0, sigma0=10.0,
                     block_m=512, mxu_dtype=None, out_dtype=None):
    """WIRE RealGaborLayer forward.

    x:      (..., in_features)
    weight: (2*out_features, in_features)   -- torch nn.Linear layout
    bias:   (2*out_features,)
    mxu_dtype: optional explicit dtype for the MXU operands (e.g. jnp.bfloat16
               on v6e/v7x); defaults to x.dtype (no silent downcast).
    out_dtype: optional output dtype (e.g. bf16 to halve writeback bytes);
               defaults to x.dtype.  Accumulation and cos/exp stay f32.
    returns (..., out_features)
    """
    in_f = x.shape[-1]
    out_f = weight.shape[0] // 2
    lead = x.shape[:-1]

    mxu_dtype = jnp.dtype(x.dtype) if mxu_dtype is None else jnp.dtype(mxu_dtype)
    out_dtype = jnp.dtype(x.dtype) if out_dtype is None else jnp.dtype(out_dtype)
    x_bytes = mxu_dtype.itemsize
    w_bytes = mxu_dtype.itemsize
    o_bytes = out_dtype.itemsize

    # ---- generation-aware VMEM budget --------------------------------------
    try:
        vmem_cap = int(pltpu.get_tpu_info().vmem_capacity_bytes)
    except Exception:
        vmem_cap = 64 * 1024 * 1024  # conservative (v7x-sized) fallback
    if vmem_cap >= 100 * 1024 * 1024:            # v5e / v6e: 128 MiB physical
        budget, vmem_limit = 100 << 20, 110 << 20
    else:                                         # v7x: 64 MiB per TensorCore
        budget, vmem_limit = 40 << 20, 48 << 20

    # ---- output-column tile tn (N-tiling only for very wide layers) --------
    out_p = _round_up(out_f, 128)
    tn = out_p
    while tn > 128 and in_f * 2 * tn * w_bytes > budget // 2:
        tn = max(128, _round_up(tn // 2, 128))
    n_tiles = pl.cdiv(out_p, tn)
    out_p = n_tiles * tn                          # repad if tn was shrunk

    # ---- row (M) tile -------------------------------------------------------
    x2d = x.reshape(-1, in_f)
    m = x2d.shape[0]
    sub = 16 if (x_bytes == 2 or o_bytes == 2) else 8   # sublane packing
    bm = max(sub, min(_round_up(block_m, sub), _round_up(m, sub)))

    def vmem_bytes(bm_):
        return (2 * bm_ * in_f * x_bytes          # x tile, double-buffered
                + in_f * 2 * tn * w_bytes         # fused W, single-buffered
                + (2 * tn) * 4                    # fused bias (f32)
                + 2 * bm_ * tn * o_bytes          # out tile, double-buffered
                + bm_ * 2 * tn * 4                # f32 lin intermediate
                + bm_ * tn * 4                    # f32 nonlinearity result
                + (2 << 20))                      # Mosaic internal scratch

    while bm > 128 and vmem_bytes(bm) > budget:   # step down, stay 128-aligned
        bm -= 128
    while bm > sub and vmem_bytes(bm) > budget:
        bm = max(sub, _round_up(bm // 2, sub))

    m_tiles = pl.cdiv(m, bm)
    # v7x has 2 TensorCores; give the parallel row axis >= 2 steps when there
    # is enough work (a spare grid step costs ~0.35us elsewhere).
    if m_tiles == 1 and m > 4 * sub:
        bm = _round_up(pl.cdiv(m, 2), sub)
        m_tiles = pl.cdiv(m, bm)

    # ---- fold omega0 / sqrt(sigma0) into the weights, fuse per-N-tile ------
    # Layout of the fused weight columns: [omega_0 | scale_0 | omega_1 | ...]
    # so each (in, 2*tn) block contains a matched omega/scale column tile.
    f32 = jnp.float32
    w_t = weight.astype(f32).T                                    # (in, 2*out)
    pad_c = out_p - out_f
    w_omega = jnp.pad(omega0 * w_t[:, :out_f], ((0, 0), (0, pad_c)))
    w_scale = jnp.pad((sigma0 ** 0.5) * w_t[:, out_f:], ((0, 0), (0, pad_c)))
    w_fused = jnp.stack(
        [w_omega.reshape(in_f, n_tiles, tn), w_scale.reshape(in_f, n_tiles, tn)],
        axis=2).reshape(in_f, 2 * out_p).astype(mxu_dtype)

    b = bias.astype(f32)
    b_omega = jnp.pad(omega0 * b[:out_f], (0, pad_c))
    b_scale = jnp.pad((sigma0 ** 0.5) * b[out_f:], (0, pad_c))
    b_fused = jnp.stack(
        [b_omega.reshape(n_tiles, tn), b_scale.reshape(n_tiles, tn)],
        axis=1).reshape(1, 2 * out_p)

    x2d = x2d.astype(mxu_dtype)

    kernel = functools.partial(_gabor_kernel, tn=tn)

    out2d = pl.pallas_call(
        kernel,
        out_shape=jax.ShapeDtypeStruct((m, out_p), out_dtype),
        grid_spec=pltpu.PrefetchScalarGridSpec(
            num_scalar_prefetch=0,
            # N outer (weight changes rarely), M inner; ragged last row tile
            # is handled by Pallas (masked writeback).
            grid=(n_tiles, m_tiles),
            in_specs=[
                _block_spec((bm, in_f), lambda j, i: (i, 0)),
                _block_spec((in_f, 2 * tn), lambda j, i: (0, j), buffer_count=1),
                _block_spec((1, 2 * tn), lambda j, i: (0, j), buffer_count=1),
            ],
            out_specs=pl.BlockSpec((bm, tn), lambda j, i: (i, j)),
        ),
        compiler_params=pltpu.CompilerParams(
            dimension_semantics=("parallel", "parallel"),
            vmem_limit_bytes=vmem_limit,
        ),
    )(x2d, w_fused, b_fused)

    # Drop padded output lanes only when actually padded (avoids a copy when
    # out_features is already a multiple of 128).
    if out_p != out_f:
        out2d = out2d[:, :out_f]
    return out2d.reshape(*lead, out_f)


def init_params(key, in_features, out_features):
    """Deterministic init mimicking torch.nn.Linear(in, 2*out) default init."""
    bound = 1.0 / (in_features ** 0.5)
    k_w, k_b = jax.random.split(key)
    weight = jax.random.uniform(k_w, (2 * out_features, in_features),
                                jnp.float32, minval=-bound, maxval=bound)
    bias = jax.random.uniform(k_b, (2 * out_features,),
                              jnp.float32, minval=-bound, maxval=bound)
    return weight, bias


def reference(x, weight, bias, omega0=10.0, sigma0=10.0):
    # Full-precision f32 reference (avoid TPU default matmul downcasting).
    lin = jnp.dot(x, weight.T, precision=jax.lax.Precision.HIGHEST) + bias
    out_f = weight.shape[0] // 2
    omega, scale = lin[..., :out_f], lin[..., out_f:]
    return jnp.cos(omega0 * omega) * jnp.exp(-(sigma0 * scale ** 2))


if __name__ == "__main__":
    key = jax.random.PRNGKey(0)
    k_x, k_p = jax.random.split(key)

    batch, seq, in_features, out_features = 2, 8, 32, 32
    x = jax.random.normal(k_x, (batch, seq, in_features), jnp.float32)
    weight, bias = init_params(k_p, in_features, out_features)

    out = real_gabor_layer(x, weight, bias, omega0=10.0, sigma0=10.0)
    out = jax.block_until_ready(out)

    ref = reference(x, weight, bias)
    assert out.shape == (batch, seq, out_features)
    # Tolerance covers MXU multi-pass f32 rounding (cos argument ~ omega0*lin
    # amplifies matmul rounding); real bugs are O(0.1-1).
    assert jnp.allclose(out, ref, atol=2e-3, rtol=2e-3), "mismatch vs reference"

    print("KERNEL_OK")
</pallas_src>

<mosaic_0001>
module attributes {stable_mosaic.version = 11 : i64} {
  func.func @_gabor_kernel(%arg0: i32, %arg1: i32, %arg2: memref<16x32xf32, #tpu.memory_space<vmem>>, %arg3: memref<32x256xf32, #tpu.memory_space<vmem>>, %arg4: memref<1x256xf32, #tpu.memory_space<vmem>>, %arg5: memref<16x128xf32, #tpu.memory_space<vmem>>) attributes {dimension_semantics = [#tpu.dimension_semantics<parallel>, #tpu.dimension_semantics<parallel>], iteration_bounds = array<i64: 1, 1>, scalar_prefetch = 0 : i64, scratch_operands = 0 : i64, tpu.core_type = #tpu.core_type<tc>, window_params = [{transform_indices = @transform_0, window_bounds = array<i64: 16, 32>}, {pipeline_mode = #tpu.pipeline_mode<synchronous>, transform_indices = @transform_1, window_bounds = array<i64: 32, 256>}, {pipeline_mode = #tpu.pipeline_mode<synchronous>, transform_indices = @transform_2, window_bounds = array<i64: 1, 256>}, {transform_indices = @transform_3, window_bounds = array<i64: 16, 128>}]} {
    %c0 = arith.constant 0 : index
    %c0_0 = arith.constant 0 : index
    %0 = vector.load %arg2[%c0, %c0_0] : memref<16x32xf32, #tpu.memory_space<vmem>>, vector<16x32xf32>
    %c0_1 = arith.constant 0 : index
    %c0_2 = arith.constant 0 : index
    %1 = vector.load %arg3[%c0_1, %c0_2] : memref<32x256xf32, #tpu.memory_space<vmem>>, vector<32x256xf32>
    %cst = arith.constant dense<0.000000e+00> : vector<16x256xf32>
    %2 = tpu.matmul %0, %1, %cst {dimension_numbers = #tpu.dot_dimension_numbers<[1], [0], [0], [1], [0, 0, 1, 1], [], []>} : vector<16x32xf32>, vector<32x256xf32>, vector<16x256xf32> -> vector<16x256xf32>
    %c0_3 = arith.constant 0 : index
    %c0_4 = arith.constant 0 : index
    %3 = vector.load %arg4[%c0_3, %c0_4] : memref<1x256xf32, #tpu.memory_space<vmem>>, vector<1x256xf32>
    %4 = vector.broadcast %3 : vector<1x256xf32> to vector<16x256xf32>
    %5 = arith.addf %2, %4 : vector<16x256xf32>
    %6 = vector.extract_strided_slice %5 {offsets = [0, 0], sizes = [16, 128], strides = [1, 1]} : vector<16x256xf32> to vector<16x128xf32>
    %7 = vector.extract_strided_slice %5 {offsets = [0, 128], sizes = [16, 128], strides = [1, 1]} : vector<16x256xf32> to vector<16x128xf32>
    %8 = math.cos %6 : vector<16x128xf32>
    %9 = arith.mulf %7, %7 : vector<16x128xf32>
    %cst_5 = arith.constant 0.000000e+00 : f32
    %10 = vector.broadcast %cst_5 : f32 to vector<16x128xf32>
    %11 = arith.subf %10, %9 : vector<16x128xf32>
    %12 = math.exp %11 : vector<16x128xf32>
    %13 = arith.mulf %8, %12 : vector<16x128xf32>
    %c0_6 = arith.constant 0 : index
    %c0_7 = arith.constant 0 : index
    %14 = vector.load %arg5[%c0_6, %c0_7] : memref<16x128xf32, #tpu.memory_space<vmem>>, vector<16x128xf32>
    tpu.vector_store %arg5[%c0_6, %c0_7], %13 {strides = array<i32>} : memref<16x128xf32, #tpu.memory_space<vmem>>, vector<16x128xf32>,
    return
  }
  func.func @transform_0(%arg0: i32, %arg1: i32) -> (i32, i32) {
    %c0_i32 = arith.constant 0 : i32
    %c0_i32_0 = arith.constant 0 : i32
    return %arg1, %c0_i32 : i32, i32
  }
  func.func @transform_1(%arg0: i32, %arg1: i32) -> (i32, i32) {
    %c0_i32 = arith.constant 0 : i32
    %c0_i32_0 = arith.constant 0 : i32
    return %c0_i32, %arg0 : i32, i32
  }
  func.func @transform_2(%arg0: i32, %arg1: i32) -> (i32, i32) {
    %c0_i32 = arith.constant 0 : i32
    %c0_i32_0 = arith.constant 0 : i32
    return %c0_i32, %arg0 : i32, i32
  }
  func.func @transform_3(%arg0: i32, %arg1: i32) -> (i32, i32) {
    %c0_i32 = arith.constant 0 : i32
    return %arg1, %arg0 : i32, i32
  }
}

</mosaic_0001>

<bundles_post_ra>
// kernel: tpu_custom_call.1
= control target key start
LH: loop header
LB: loop body
LE: loop exit
PB: predicated region body
PF: predicated region fallthrough
CT: control target
= control target key end

     0   :  { %8 = vsyncpa [#allocation3], 0  ;;  %s683_s0 = inlined_call_operand.hbm [shape: f32[16,32], index: 0, kind: input, shape index: {}]   ;;  %s684_s1 = inlined_call_operand.hbm [shape: f32[32,256], index: 1, kind: input, shape index: {}]   ;;  %s685_s2 = inlined_call_operand.vmem [shape: f32[1,256], index: 2, kind: input, shape index: {}]   ;;  %s686_s3 = inlined_call_operand.hbm [shape: f32[16,128], index: 3, kind: output, shape index: {}]  }
   0x1   :  { %9 = vsyncpa [#allocation6], 0 }
   0x2   :  { %10 = vsyncpa [#allocation4], 0  ;;  %s513_s12 = smov [#allocation2]   ;;  %s441_s16 = scalar_lea.hbm %s683_s0, 256 }
   0x3   :  { %s16_s13 = sshll.u32 %s513_s12, 4  ;;  %p442_p0 = scmp.ne.s32.totalorder %s683_s0, %s441_s16  ;;  %s17_s13 = int_to_ptr.vmem [resolvable:$true] %s16_s13 }
   0x4   :  { %p445_p1 = scmp.lt.u32.totalorder %s441_s16, %s683_s0 }
   0x6   :  { %p447_p2 = pnand %p445_p1, %p442_p0 }
   0x8   :  { %450 = shalt.err (!%p447_p2)
}
   0x9   :  { %s451_s21 = scalar_lea.vmem %s17_s13, 256  ;;  %p456_p4 = scmp.lt.s32.totalorder %s17_s13, %s17_s13 }
   0xa   :  { %p452_p3 = scmp.ne.s32.totalorder %s17_s13, %s451_s21  ;;  %p457_p5 = scmp.lt.s32.totalorder %s451_s21, %s451_s21 }
   0xc   :  { %p458_p6 = por %p457_p5, %p456_p4 }
   0xe   :  { %p459_p7 = pnand %p458_p6, %p452_p3 }
  0x10   :  { %462 = shalt.err (!%p459_p7)
}
  0x11   :  { %s514_s22 = smov 128   ;;  %s515_s23 = smov 8  }
  0x12   :  { %22 = dma.hbm_to_vmem [thread:$0]  %s683_s0, 256, %s17_s13, [#allocation3], %s514_s22, %s514_s22, %s515_s23  }
  0x13   :  { %s516_s26 = smov [#allocation5]   ;;  %s463_s30 = scalar_lea.hbm %s684_s1, 1024 }
  0x14   :  { %s28_s27 = sshll.u32 %s516_s26, 4  ;;  %p464_p8 = scmp.ne.s32.totalorder %s684_s1, %s463_s30  ;;  %s29_s27 = int_to_ptr.vmem [resolvable:$true] %s28_s27 }
  0x15   :  { %p467_p9 = scmp.lt.u32.totalorder %s463_s30, %s684_s1 }
  0x17   :  { %p469_p10 = pnand %p467_p9, %p464_p8 }
  0x19   :  { %472 = shalt.err (!%p469_p10)
}
  0x1a   :  { %s473_s8 = scalar_lea.vmem %s29_s27, 1024  ;;  %p478_p12 = scmp.lt.s32.totalorder %s29_s27, %s29_s27 }
  0x1b   :  { %p474_p11 = scmp.ne.s32.totalorder %s29_s27, %s473_s8  ;;  %p479_p13 = scmp.lt.s32.totalorder %s473_s8, %s473_s8 }
  0x1d   :  { %p480_p0 = por %p479_p13, %p478_p12 }
  0x1f   :  { %p481_p1 = pnand %p480_p0, %p474_p11 }
  0x21   :  { %484 = shalt.err (!%p481_p1)
}
  0x22   :  { %s517_s0 = smov 256   ;;  %s518_s9 = smov 16  }
  0x23   :  { %34 = dma.hbm_to_vmem [thread:$0]  %s684_s1, 1024, %s29_s27, [#allocation6], %s517_s0, %s517_s0, %s518_s9  }
  0x24   :  { %507 = dma.done.wait [#allocation3], 256  }
  0x25   :  { %508 = vsyncadd [#allocation3], 4294967040 }
  0x26   :  { %509 = dma.done.wait [#allocation6], 1024  }
  0x27   :  { %510 = vsyncadd [#allocation6], 4294966272  ;;  %v519_v0 = vmov 0.0   ;;  %v46_v1 = vld [vmem:[#allocation5 + $0x8] sm:$0xff]  ;;  %v48_v2 = vld [vmem:[#allocation5 + $0x18] sm:$0xff]  ;;  %vm65_vm0 = vcmask 261120   ;;  %v55_v15 = vlaneseq }
  0x28   :  { %136 = vmatprep.mubr.f32.mxu0 %v519_v0  ;;  %142 = vmatprep.mubr.f32.mxu1 %v519_v0  ;;  %v45_v3 = vld [vmem:[#allocation5] sm:$0xff]  ;;  %v395_v4 = vpack.c.bf16 %v48_v2, %v46_v1  ;;  %v47_v5 = vld [vmem:[#allocation5 + $0x10] sm:$0xff]  ;;  %v50_v6 = vld [vmem:[#allocation5 + $0x28] sm:$0xff]  ;;  %v520_v50 = vmov 683565275  }
  0x29   :  { %v52_v7 = vld [vmem:[#allocation5 + $0x38] sm:$0xff]  ;;  %v397_v8 = vpack.c.bf16 %v47_v5, %v45_v3  ;;  %v49_v10 = vld [vmem:[#allocation5 + $0x20] sm:$0xff]  ;;  %v51_v11 = vld [vmem:[#allocation5 + $0x30] sm:$0xff]  ;;  %v56_v16 = vshrl.u32 %v55_v15, 7  ;;  %v521_v54 = vmov 2475754826  }
  0x2a   :  { %v399_v9 = vpack.c.bf16 %v52_v7, %v50_v6  ;;  %396 = vmatprep.subr.bf16.mxu0 %v395_v4  ;;  %403 = vmatprep.subr.bf16.mxu1 %v395_v4  ;;  %v401_v12 = vpack.c.bf16 %v51_v11, %v49_v10  ;;  %v43_v13 = vld [vmem:[#allocation2] sm:$0xff]  ;;  %v44_v14 = vld [vmem:[#allocation2 + $0x8] sm:$0xff]  ;;  %v522_v56 = vmov 2131351028   ;;  %v523_v58 = vmov 2102212464  }
  0x2b   :  { %398 = vmatpush1.bf16.msra.mxu0 %v397_v8  ;;  %405 = vmatpush1.bf16.msra.mxu1 %v397_v8  ;;  %v57_v17 = vsub.s32 0, %v56_v16  ;;  %v53_v18 = vld [vmem:[%s685_s2] sm:$0x3]  ;;  %v61_v19 = vsub.s32 1, %v56_v16  ;;  %v524_v60 = vmov 920167782  }
  0x2c   :  { %400 = vmatprep.subr.bf16.mxu0 %v399_v9  ;;  %404 = vmatprep.subr.bf16.mxu1 %v399_v9  ;;  %v525_v3 = vmov 1326507024   ;;  %s526_s2 = smov [#allocation7]  }
  0x2d   :  { %v58_v20 = vrot.slane %v53_v18, %v57_v17  ;;  %v62_v21 = vrot.slane %v53_v18, %v61_v19  ;;  %s372_s13 = sshll.u32 %s526_s2, 4  ;;  %s373_s13 = int_to_ptr.vmem [resolvable:$true] %s372_s13 }
  0x2e   :  { %s485_s14 = scalar_lea.vmem %s373_s13, 256  ;;  %p490_p3 = scmp.lt.s32.totalorder %s373_s13, %s373_s13 }
  0x2f   :  { %402 = vmatpush1.bf16.msra.mxu0 %v401_v12  ;;  %406 = vmatpush1.bf16.msra.mxu1 %v401_v12  ;;  %p486_p2 = scmp.ne.s32.totalorder %s373_s13, %s485_s14  ;;  %p491_p4 = scmp.lt.s32.totalorder %s485_s14, %s485_s14 }
  0x31   :  { %p492_p5 = por %p491_p4, %p490_p3 }
  0x32   :  { %385 = vmatmul.mubr.msk.f32.vlgmr.msra.gmra.mrb[0].mxu0 %vm65_vm0, %v43_v13  ;;  %386 = vmatmul.mubr.msk.f32.vlgmr.msra.gmra.mrb[0].mxu1 %vm65_vm0, %v44_v14 }
  0x33   :  { %p493_p6 = pnand %p492_p5, %p486_p2 }
 0x105   :  { %v138_v22 = vpop.f32.mrb[0].mxu0  ;;  %v144_v23 = vpop.f32.mrb[0].mxu1 }
 0x106   :  { %v577_v24 = vadd.f32 %v138_v22, %v58_v20  ;;  %v579_v25 = vadd.f32 %v144_v23, %v58_v20  ;;  %v140_v26 = vpop.f32.mrb[1].mxu0  ;;  %v146_v27 = vpop.f32.mrb[1].mxu1 }
 0x107   :  { %v581_v28 = vadd.f32 %v140_v26, %v62_v21  ;;  %v583_v29 = vadd.f32 %v146_v27, %v62_v21 }
 0x108   :  { %v149_v30 = vand.u32 2147483647, %v577_v24  ;;  %v152_v31 = vand.u32 2139095040, %v577_v24  ;;  %v255_v32 = vand.u32 2139095040, %v579_v25  ;;  %v252_v35 = vand.u32 2147483647, %v579_v25 }
 0x109   :  { %vm151_vm15 = vcmp.lt.s32.totalorder %v577_v24, 0 }
 0x10a   :  { %v153_v33 = vshrl.u32 %v152_v31, 23  ;;  %v156_v34 = vand.u32 8388607, %v149_v30  ;;  %v256_v36 = vshrl.u32 %v255_v32, 23  ;;  %v593_v41 = vand.u32 8388607, %v252_v35 }
 0x10b   :  { %vm641_vm0 = vcmp.le.f32.partialorder %v149_v30, 0.7853982  ;;  %v356_v30 = vmul.f32 %v583_v29, %v583_v29 }
 0x10c   :  { %v387_v37 = vadd.s32 4294967169, %v153_v33  ;;  %v391_v38 = vadd.s32 4294967169, %v256_v36  ;;  %v157_v40 = vor.u32 8388608, %v156_v34  ;;  %v260_v48 = vor.u32 8388608, %v593_v41 }
 0x10e   :  { %v159_v39 = vadd.s32 1, %v387_v37  ;;  %v262_v42 = vadd.s32 1, %v391_v38  ;;  %v595_v47 = vshll.u32 %v157_v40, 8 }
 0x110   :  { %vm160_vm1 = vcmp.gt.s32.totalorder %v159_v39, 0  ;;  %vm263_vm2 = vcmp.gt.s32.totalorder %v262_v42, 0 }
 0x111   :  { %v161_v43 = vsel %vm160_vm1, %v159_v39, 0  ;;  %v264_v46 = vsel %vm263_vm2, %v262_v42, 0  ;;  %vm254_vm1 = vcmp.lt.s32.totalorder %v579_v25, 0  ;;  %vm655_vm2 = vcmp.le.f32.partialorder %v252_v35, 0.7853982 }
 0x112   :  { %v162_v44 = vshrl.u32 %v161_v43, 5  ;;  %v163_v45 = vand.u32 31, %v161_v43  ;;  %v598_v52 = vshrl.u32 %v264_v46, 5  ;;  %v266_v53 = vand.u32 31, %v264_v46 }
 0x114   :  { %v164_v49 = vsub.s32 32, %v163_v45  ;;  %v166_v51 = vshll.u32 %v520_v50, %v163_v45  ;;  %v169_v55 = vshll.u32 %v521_v54, %v163_v45  ;;  %v172_v57 = vshll.u32 %v522_v56, %v163_v45 }
 0x115   :  { %v175_v59 = vshll.u32 %v523_v58, %v163_v45  ;;  %v178_v61 = vshll.u32 %v524_v60, %v163_v45  ;;  %vm181_vm3 = vcmp.lt.s32.totalorder %v162_v44, 1  ;;  %vm182_vm4 = vcmp.lt.s32.totalorder %v162_v44, 2 }
 0x116   :  { %v167_v62 = vshrl.u32 %v521_v54, %v164_v49  ;;  %v170_v63 = vshrl.u32 %v522_v56, %v164_v49  ;;  %v173_v0 = vshrl.u32 %v523_v58, %v164_v49  ;;  %v165_v1 = vshrl.u32 %v520_v50, %v164_v49 }
 0x117   :  { %v176_v2 = vshrl.u32 %v524_v60, %v164_v49  ;;  %v179_v4 = vshrl.u32 %v525_v3, %v164_v49  ;;  %v267_v8 = vsub.s32 32, %v266_v53  ;;  %vm183_vm5 = vcmp.lt.s32.totalorder %v162_v44, 3 }
 0x118   :  { %v168_v5 = vor.u32 %v167_v62, %v166_v51  ;;  %v171_v6 = vor.u32 %v170_v63, %v169_v55  ;;  %v174_v7 = vor.u32 %v173_v0, %v172_v57  ;;  %vm184_vm6 = vcmp.lt.s32.totalorder %v162_v44, 4 }
 0x119   :  { %v177_v9 = vor.u32 %v176_v2, %v175_v59  ;;  %v180_v10 = vor.u32 %v179_v4, %v178_v61  ;;  %v269_v18 = vshll.u32 %v520_v50, %v266_v53  ;;  %v270_v21 = vshrl.u32 %v521_v54, %v267_v8 }
 0x11a   :  { %v185_v11 = vsel %vm181_vm3, %v165_v1, %v168_v5  ;;  %v186_v12 = vsel %vm184_vm6, %v174_v7, 2102212464  ;;  %v189_v13 = vsel %vm181_vm3, %v168_v5, %v171_v6  ;;  %v193_v14 = vsel %vm181_vm3, %v171_v6, %v174_v7 }
 0x11b   :  { %v187_v15 = vsel %vm183_vm5, %v171_v6, %v186_v12  ;;  %v190_v16 = vsel %vm184_vm6, %v177_v9, 920167782  ;;  %v194_v17 = vsel %vm184_vm6, %v180_v10, 1326507024  ;;  %v272_v22 = vshll.u32 %v521_v54, %v266_v53 }
 0x11c   :  { %v191_v19 = vsel %vm183_vm5, %v174_v7, %v190_v16  ;;  %v195_v20 = vsel %vm183_vm5, %v177_v9, %v194_v17  ;;  %v188_v23 = vsel %vm182_vm4, %v185_v11, %v187_v15  ;;  %v273_v31 = vshrl.u32 %v522_v56, %v267_v8 }
 0x11d   :  { %v192_v26 = vsel %vm182_vm4, %v189_v13, %v191_v19  ;;  %v196_v27 = vsel %vm182_vm4, %v193_v14, %v195_v20  ;;  %v271_v37 = vor.u32 %v270_v21, %v269_v18  ;;  %v275_v39 = vshll.u32 %v522_v56, %v266_v53 }
 0x11e   :  { %v607_v32 = vmul.u32.u64.low %v595_v47, %v196_v27  ;;  %v608_v33 = vmul.u32.u64.high %v595_v47, %v196_v27, %v607_v32  ;;  %v611_v34 = vmul.u32.u64.low %v595_v47, %v192_v26  ;;  %v612_v36 = vmul.u32.u64.high %v595_v47, %v192_v26, %v611_v34 }
 0x11f   :  { %v274_v38 = vor.u32 %v273_v31, %v272_v22  ;;  %v276_v40 = vshrl.u32 %v523_v58, %v267_v8  ;;  %v278_v41 = vshll.u32 %v523_v58, %v266_v53  ;;  %v279_v42 = vshrl.u32 %v524_v60, %v267_v8 }
 0x120   :  { %v282_v43 = vshrl.u32 %v525_v3, %v267_v8  ;;  %v300_v45 = vshll.u32 %v260_v48, 8  ;;  %v204_v44 = vmul.u32 %v595_v47, %v188_v23  ;;  %v268_v46 = vshrl.u32 %v520_v50, %v267_v8 }
 0x121   :  { %v277_v49 = vor.u32 %v276_v40, %v275_v39  ;;  %v281_v51 = vshll.u32 %v524_v60, %v266_v53  ;;  %vm206_vm7 = vc.u32 %v608_v33, %v611_v34  ;;  %v207_v54 = vadd.s32 1, %v612_v36 }
 0x122   :  { %v280_v55 = vor.u32 %v279_v42, %v278_v41  ;;  %vm284_vm8 = vcmp.lt.s32.totalorder %v598_v52, 1  ;;  %vm286_vm9 = vcmp.lt.s32.totalorder %v598_v52, 3  ;;  %vm287_vm10 = vcmp.lt.s32.totalorder %v598_v52, 4 }
 0x123   :  { %v283_v57 = vor.u32 %v282_v43, %v281_v51  ;;  %v292_v56 = vsel %vm284_vm8, %v271_v37, %v274_v38  ;;  %v208_v48 = vsel %vm206_vm7, %v207_v54, %v612_v36  ;;  %v289_v58 = vsel %vm287_vm10, %v277_v49, 2102212464 }
 0x124   :  { %v293_v47 = vsel %vm287_vm10, %v280_v55, 920167782  ;;  %v296_v50 = vsel %vm284_vm8, %v274_v38, %v277_v49  ;;  %v209_v59 = vadd.s32 %v208_v48, %v204_v44  ;;  %vm285_vm11 = vcmp.lt.s32.totalorder %v598_v52, 2 }
 0x125   :  { %v294_v53 = vsel %vm286_vm9, %v277_v49, %v293_v47  ;;  %v297_v60 = vsel %vm287_vm10, %v283_v57, 1326507024  ;;  %v288_v61 = vsel %vm284_vm8, %v268_v46, %v271_v37  ;;  %v290_v62 = vsel %vm286_vm9, %v274_v38, %v289_v58 }
 0x126   :  { %v295_v63 = vsel %vm285_vm11, %v292_v56, %v294_v53  ;;  %v298_v0 = vsel %vm286_vm9, %v280_v55, %v297_v60  ;;  %v210_v1 = vadd.s32 536870912, %v209_v59  ;;  %v291_v8 = vsel %vm285_vm11, %v288_v61, %v290_v62 }
 0x127   :  { %v299_v2 = vsel %vm285_vm11, %v296_v50, %v298_v0  ;;  %v622_v3 = vmul.u32.u64.low %v300_v45, %v295_v63  ;;  %v623_v4 = vmul.u32.u64.high %v300_v45, %v295_v63, %v622_v3  ;;  %v307_v52 = vmul.u32 %v300_v45, %v291_v8 }
 0x128   :  { %v625_v5 = vmul.u32.u64.low %v300_v45, %v299_v2  ;;  %v626_v6 = vmul.u32.u64.high %v300_v45, %v299_v2, %v625_v5  ;;  %v211_v7 = vshrl.u32 %v210_v1, 30  ;;  %v205_v26 = vadd.s32 %v611_v34, %v608_v33 }
 0x129   :  { %v310_v10 = vadd.s32 1, %v623_v4  ;;  %v355_v34 = vmul.f32 %v581_v28, %v581_v28  ;;  %v358_v8 = vsub.f32 0.0, %v356_v30  ;;  %vm241_vm6 = vweird.f32 %v577_v24 }
 0x12a   :  { %v212_v9 = vshll.u32 %v211_v7, 30  ;;  %vm309_vm12 = vc.u32 %v626_v6, %v622_v3  ;;  %v308_v49 = vadd.s32 %v622_v3, %v626_v6  ;;  %v235_v53 = vsub.s32 4, %v211_v7 }
 0x12b   :  { %v311_v12 = vsel %vm309_vm12, %v310_v10, %v623_v4  ;;  %v357_v60 = vsub.f32 0.0, %v355_v34  ;;  %vm344_vm10 = vweird.f32 %v579_v25 }
 0x12c   :  { %v213_v11 = vsub.s32 %v209_v59, %v212_v9  ;;  %v312_v13 = vadd.s32 %v311_v12, %v307_v52  ;;  %v236_v0 = vsel %vm151_vm15, %v235_v53, %v211_v7  ;;  %v361_v12 = vmul.f32 1.442695, %v358_v8 }
 0x12d   :  { %v359_v1 = vmul.f32 1.442695, %v357_v60  ;;  %v238_v4 = vsel %vm641_vm0, 0, %v236_v0 }
 0x12e   :  { %v215_v14 = vsub.s32 0, %v213_v11  ;;  %v313_v15 = vadd.s32 536870912, %v312_v13  ;;  %v242_v9 = vand.u32 3, %v238_v4 }
 0x130   :  { %v388_v16 = vmin.u32 %v215_v14, %v213_v11  ;;  %v631_v17 = vshrl.u32 %v313_v15, 30  ;;  %vm247_vm3 = vcmp.eq.s32.totalorder %v242_v9, 2  ;;  %vm244_vm4 = vcmp.eq.s32.totalorder %v242_v9, 0 }
 0x131   :  { %vm243_vm5 = vcmp.lt.s32.totalorder %v242_v9, 2 }
 0x132   :  { %v217_v18 = vclz %v388_v16  ;;  %v315_v19 = vshll.u32 %v631_v17, 30  ;;  %v338_v7 = vsub.s32 4, %v631_v17 }
 0x134   :  { %v389_v20 = vadd.s32 4294967294, %v217_v18  ;;  %v316_v21 = vsub.s32 %v312_v13, %v315_v19 }
 0x136   :  { %vm390_vm13 = vcmp.lt.s32.totalorder %v389_v20, 0  ;;  %v318_v23 = vsub.s32 0, %v316_v21 }
 0x137   :  { %v220_v22 = vsel %vm390_vm13, 0, %v389_v20 }
 0x138   :  { %v221_v27 = vsub.s32 32, %v220_v22  ;;  %v225_v31 = vsub.s32 4294967266, %v220_v22  ;;  %v392_v32 = vmin.u32 %v318_v23, %v316_v21  ;;  %v222_v36 = vshll.u32 %v213_v11, %v220_v22 }
 0x139   :  { %v339_v11 = vsel %vm254_vm1, %v338_v7, %v631_v17 }
 0x13a   :  { %v223_v37 = vshrl.u32 %v205_v26, %v221_v27  ;;  %v226_v38 = vadd.s32 127, %v225_v31  ;;  %v320_v39 = vclz %v392_v32  ;;  %v341_v16 = vsel %vm655_vm2, 0, %v339_v11 }
 0x13c   :  { %v224_v40 = vor.u32 %v223_v37, %v222_v36  ;;  %v227_v41 = vshll.u32 %v226_v38, 23  ;;  %v393_v42 = vadd.s32 4294967294, %v320_v39 }
 0x13e   :  { %v228_v43 = vor.u32 4788187, %v227_v41  ;;  %vm394_vm14 = vcmp.lt.s32.totalorder %v393_v42, 0  ;;  %v231_v44 = vcvt.s32.f32 %v224_v40 }
 0x13f   :  { %v323_v46 = vsel %vm394_vm14, 0, %v393_v42 }
 0x140   :  { %v229_v45 = vand.u32 2147483647, %v228_v43  ;;  %v324_v51 = vsub.s32 32, %v323_v46  ;;  %v328_v54 = vsub.s32 4294967266, %v323_v46  ;;  %v325_v55 = vshll.u32 %v316_v21, %v323_v46 }
 0x141   :  { %v345_v21 = vand.u32 3, %v341_v16 }
 0x142   :  { %v232_v33 = vmul.f32 %v231_v44, %v229_v45  ;;  %v326_v57 = vshrl.u32 %v308_v49, %v324_v51  ;;  %v329_v56 = vadd.s32 127, %v328_v54 }
 0x143   :  { %vm350_vm7 = vcmp.eq.s32.totalorder %v345_v21, 2  ;;  %vm347_vm8 = vcmp.eq.s32.totalorder %v345_v21, 0  ;;  %vm346_vm9 = vcmp.lt.s32.totalorder %v345_v21, 2 }
 0x144   :  { %v233_v48 = vxor.u32 2147483648, %v232_v33  ;;  %v327_v58 = vor.u32 %v326_v57, %v325_v55  ;;  %v330_v47 = vshll.u32 %v329_v56, 23 }
 0x146   :  { %v234_v59 = vsel %vm151_vm15, %v233_v48, %v232_v33  ;;  %v331_v61 = vor.u32 4788187, %v330_v47  ;;  %v334_v63 = vcvt.s32.f32 %v327_v58 }
 0x147   :  { %v237_v28 = vsel %vm641_vm0, %v577_v24, %v234_v59 }
 0x148   :  { %429 = vcosq.f32 %v237_v28  ;;  %v332_v62 = vand.u32 2147483647, %v331_v61 }
 0x149   :  { %431 = vsinq.f32 %v237_v28 }
 0x14a   :  { %v335_v2 = vmul.f32 %v334_v63, %v332_v62  ;;  %433 = vpow2.f32 %v359_v1 }
 0x14c   :  { %v336_v3 = vxor.u32 2147483648, %v335_v2 }
 0x14e   :  { %v337_v6 = vsel %vm254_vm1, %v336_v3, %v335_v2 }
 0x14f   :  { %v340_v29 = vsel %vm655_vm2, %v579_v25, %v337_v6 }
 0x150   :  { %435 = vcosq.f32 %v340_v29 }
 0x151   :  { %437 = vsinq.f32 %v340_v29 }
 0x152   :  { %v430_v10 = vpop.eup %429  ;;  %439 = vpow2.f32 %v361_v12 }
 0x153   :  { %v432_v52 = vpop.eup %431  ;;  %v248_v35 = vxor.u32 2147483648, %v430_v10 }
 0x154   :  { %v245_v13 = vxor.u32 2147483648, %v432_v52  ;;  %v434_v19 = vpop.eup %433 }
 0x155   :  { %v249_v14 = vsel %vm247_vm3, %v248_v35, %v432_v52 }
 0x156   :  { %v246_v15 = vsel %vm244_vm4, %v430_v10, %v245_v13 }
 0x157   :  { %v250_v18 = vsel %vm243_vm5, %v246_v15, %v249_v14 }
 0x158   :  { %v251_v20 = vsel %vm241_vm6, nan, %v250_v18 }
 0x159   :  { %v363_v22 = vmul.f32 %v434_v19, %v251_v20 }
 0x15a   :  { %v436_v17 = vpop.eup %435 }
 0x15b   :  { %365 = vst [vmem:[#allocation7] sm:$0xff] %v363_v22  ;;  %v438_v23 = vpop.eup %437  ;;  %v351_v26 = vxor.u32 2147483648, %v436_v17 }
 0x15c   :  { %v348_v27 = vxor.u32 2147483648, %v438_v23  ;;  %v440_v36 = vpop.eup %439 }
 0x15d   :  { %v352_v31 = vsel %vm350_vm7, %v351_v26, %v438_v23 }
 0x15e   :  { %v349_v32 = vsel %vm347_vm8, %v436_v17, %v348_v27 }
 0x15f   :  { %v353_v24 = vsel %vm346_vm9, %v349_v32, %v352_v31 }
 0x160   :  { %v354_v37 = vsel %vm344_vm10, nan, %v353_v24 }
 0x161   :  { %v364_v38 = vmul.f32 %v440_v36, %v354_v37 }
 0x163   :  { %366 = vst [vmem:[#allocation7 + $0x8] sm:$0xff] %v364_v38 }
 0x164   :  { %496 = shalt.err (!%p493_p6)
}
 0x165   :  { %s497_s17 = scalar_lea.hbm %s686_s3, 256 }
 0x166   :  { %p498_p7 = scmp.ne.s32.totalorder %s686_s3, %s497_s17  ;;  %p501_p8 = scmp.lt.u32.totalorder %s497_s17, %s686_s3 }
 0x168   :  { %p503_p9 = pnand %p501_p8, %p498_p7 }
 0x16a   :  { %506 = shalt.err (!%p503_p9)
}
 0x16b   :  { %378 = dma.vmem_to_hbm [thread:$0]  %s373_s13, 256, %s686_s3, [#allocation4], %s514_s22, %s514_s22, %s515_s23  }
 0x16c   :  { %511 = dma.done.wait [#allocation4], 256  }
 0x16d   :  { %512 = vsyncadd [#allocation4], 4294967040 }
 0x16e   :  { %382 = vsyncpa [#allocation3], 1 }
 0x16f   :  { %383 = vsyncpa [#allocation6], 1 }
 0x170   :  { %384 = vsyncpa [#allocation4], 1 }

</bundles_post_ra>
